<compile_context>
chip_gen: v7x
topology: tpu7x:2x2x1
jax: 0.10.0
libtpu: 0.0.40
codegen_flags: <defaults>
</compile_context>

<pallas_src>
import functools

import jax
import jax.numpy as jnp
from jax.experimental import pallas as pl
from jax.experimental.pallas import tpu as pltpu

_LANES = 128            # lane width: keep the last dim a multiple of 128
_MAX_TILE_ROWS = 8192   # 8192 * 128 * 4 B = 4 MiB per f32 block (fits v7x VMEM w/ 2x buffering)


def _copy_kernel(x_ref, o_ref):
    # Identity: copy the input tile to the output tile.
    o_ref[...] = x_ref[...]


def _identity_copy_2d(x2d: jax.Array) -> jax.Array:
    """Tiled, lane-dense, aliased identity copy of a (rows, 128) slab."""
    rows, lanes = x2d.shape
    tb = rows if rows <= _MAX_TILE_ROWS else _MAX_TILE_ROWS
    grid = (pl.cdiv(rows, tb),)
    return pl.pallas_call(
        _copy_kernel,
        out_shape=jax.ShapeDtypeStruct(x2d.shape, x2d.dtype),
        grid_spec=pl.GridSpec(
            grid=grid,
            in_specs=[pl.BlockSpec((tb, lanes), lambda i: (i, 0))],
            out_specs=pl.BlockSpec((tb, lanes), lambda i: (i, 0)),
        ),
        input_output_aliases={0: 0},
        compiler_params=pltpu.CompilerParams(
            dimension_semantics=("parallel",),
        ),
    )(x2d)


def identity_encoder_forward(obs: jax.Array, detach: bool = False) -> jax.Array:
    """IdentityEncoder.forward: the fastest copy is no copy."""
    # `detach` has no forward-pass effect (autograd-only in PyTorch).
    return obs


@functools.partial(jax.jit, static_argnames=("detach",))
def identity_encoder_forward_kernel(obs: jax.Array, detach: bool = False) -> jax.Array:
    """Pallas-kernel version (for when a kernel must exist at this interface)."""
    total = obs.size
    if total % _LANES == 0:
        # Lane-dense path: unmasked full-width stores, tiled over rows.
        x2d = obs.reshape(total // _LANES, _LANES)
        out2d = _identity_copy_2d(x2d)
        return out2d.reshape(obs.shape)

    # Fallback for lane-ragged tiny inputs: whole array as one VMEM block,
    # still aliased so no second HBM allocation is required.
    return pl.pallas_call(
        _copy_kernel,
        out_shape=jax.ShapeDtypeStruct(obs.shape, obs.dtype),
        in_specs=[pl.BlockSpec(memory_space=pltpu.MemorySpace.VMEM)],
        out_specs=pl.BlockSpec(memory_space=pltpu.MemorySpace.VMEM),
        input_output_aliases={0: 0},
    )(obs)


if __name__ == "__main__":
    # IdentityEncoder.__init__ has no parameters (the conv args are ignored),
    # so there is nothing to initialize beyond the input.
    batch, feature_dim = 8, 32  # obs_shape = (feature_dim,); batch*feature_dim % 128 == 0

    key = jax.random.PRNGKey(0)
    obs = jax.random.normal(key, (batch, feature_dim), dtype=jnp.float32)

    # Fast path: identity with no kernel at all.
    out_fast = identity_encoder_forward(obs)

    # Kernel path (lane-dense, tiled, aliased).
    out_kernel = identity_encoder_forward_kernel(obs)
    jax.block_until_ready(out_kernel)

    assert out_fast.shape == obs.shape and out_fast.dtype == obs.dtype
    assert out_kernel.shape == obs.shape and out_kernel.dtype == obs.dtype
    assert bool(jnp.all(out_fast == obs))
    assert bool(jnp.all(out_kernel == obs))
    print("KERNEL_OK")
</pallas_src>

<mosaic_0001>
module attributes {stable_mosaic.version = 11 : i64} {
  func.func @_copy_kernel(%arg0: i32, %arg1: memref<2x128xf32, #tpu.memory_space<vmem>>, %arg2: memref<2x128xf32, #tpu.memory_space<vmem>>) attributes {dimension_semantics = [#tpu.dimension_semantics<parallel>], iteration_bounds = array<i64: 1>, scalar_prefetch = 0 : i64, scratch_operands = 0 : i64, tpu.core_type = #tpu.core_type<tc>, window_params = [{transform_indices = @transform_0, window_bounds = array<i64: 2, 128>}, {transform_indices = @transform_1, window_bounds = array<i64: 2, 128>}]} {
    %c0 = arith.constant 0 : index
    %c0_0 = arith.constant 0 : index
    %0 = vector.load %arg1[%c0, %c0_0] : memref<2x128xf32, #tpu.memory_space<vmem>>, vector<2x128xf32>
    %c0_1 = arith.constant 0 : index
    %c0_2 = arith.constant 0 : index
    %1 = vector.load %arg2[%c0_1, %c0_2] : memref<2x128xf32, #tpu.memory_space<vmem>>, vector<2x128xf32>
    tpu.vector_store %arg2[%c0_1, %c0_2], %0 {strides = array<i32>} : memref<2x128xf32, #tpu.memory_space<vmem>>, vector<2x128xf32>,
    return
  }
  func.func @transform_0(%arg0: i32) -> (i32, i32) {
    %c0_i32 = arith.constant 0 : i32
    %c0_i32_0 = arith.constant 0 : i32
    return %arg0, %c0_i32 : i32, i32
  }
  func.func @transform_1(%arg0: i32) -> (i32, i32) {
    %c0_i32 = arith.constant 0 : i32
    %c0_i32_0 = arith.constant 0 : i32
    return %arg0, %c0_i32 : i32, i32
  }
}

</mosaic_0001>

<bundles_post_ra>
// kernel: identity_encoder_forward_kernel.1
= control target key start
LH: loop header
LB: loop body
LE: loop exit
PB: predicated region body
PF: predicated region fallthrough
CT: control target
= control target key end

     0   :  { %s30_s0 = inlined_call_operand.vmem [shape: f32[2,128], index: 0, kind: input, shape index: {}, may-alias: {0,1}]   ;;  %s31_s1 = inlined_call_operand.vmem [shape: f32[2,128], index: 1, kind: output, shape index: {}, may-alias: {0,1}]  }
   0x1   :  { %v8_v0 = vld [vmem:[%s30_s0] sm:$0x3] }
   0x2   :  { %9 = vst [vmem:[%s31_s1] sm:$0x3] %v8_v0 }

</bundles_post_ra>
